<compile_context>
chip_gen: v6e
topology: v6e:2x2x1
jax: 0.10.0
libtpu: 0.0.40
codegen_flags: <defaults>
</compile_context>

<pallas_src>
import math
from functools import partial

import jax
import jax.numpy as jnp
from jax.experimental import pallas as pl
from jax.experimental.pallas import tpu as pltpu

_LANE = 128
_BLOCK_BYTES = 4 * 1024 * 1024       # ~4 MiB per block (per review)
_SMALL_ROWS = 512                    # below this, fold samples into one block
_VMEM_LIMIT = 48 * 1024 * 1024       # headroom under v7x 64 MiB physical VMEM


def _sublane_quantum(dtype) -> int:
    """Native sublane row quantum: 8 (32-bit), 16 (16-bit), 32 (8-bit)."""
    itemsize = jnp.dtype(dtype).itemsize
    return max(8, 8 * (4 // itemsize))


def _batched_kernel(scale_ref, x_ref, o_ref):
    # scale_ref: (BB, 1, 1) f32 VMEM; x_ref / o_ref: (BB, rows, 128).
    # Single multiply + cast; scale stays f32 so the product is computed in f32.
    o_ref[...] = (x_ref[...] * scale_ref[...]).astype(o_ref.dtype)


def _per_sample_kernel(inv_keep, mask_ref, x_ref, o_ref):
    # mask_ref: (B,) int32 in SMEM (scalar prefetch); x_ref/o_ref: (1, TR, 128).
    b = pl.program_id(0)
    keep = mask_ref[b] != 0

    @pl.when(keep)
    def _():
        o_ref[...] = (x_ref[...] * jnp.float32(inv_keep)).astype(o_ref.dtype)

    @pl.when(jnp.logical_not(keep))
    def _():
        # Exact zeros for dropped samples (input block may be a stale reused
        # tile because of the DMA-skip index_map, so never read it here).
        o_ref[...] = jnp.zeros_like(o_ref)


def drop_path(x, drop_prob: float = 0.0, training: bool = False,
              *, key=None, seed: int = 0, block_bytes: int = _BLOCK_BYTES):
    """JAX/Pallas equivalent of the PyTorch drop_path()."""
    if drop_prob == 0.0 or not training:
        return x
    if x.size == 0:
        return x

    keep_prob = 1.0 - float(drop_prob)
    orig_shape = x.shape
    B = orig_shape[0]

    if key is None:
        key = jax.random.PRNGKey(seed)
    # torch semantics: floor(keep_prob + U[0,1)) -> Bernoulli(keep_prob) mask.
    u = jax.random.uniform(key, (B,), dtype=jnp.float32)
    mask_f = jnp.floor(jnp.float32(keep_prob) + u)            # (B,) in {0., 1.}
    inv_keep = (1.0 / keep_prob) if keep_prob > 0.0 else 0.0  # guard drop_prob=1

    n = math.prod(orig_shape[1:])
    itemsize = jnp.dtype(x.dtype).itemsize
    sub = _sublane_quantum(x.dtype)
    bytes_per_row = _LANE * itemsize

    # Pad only to a 128-lane multiple, and only when needed (aligned shapes --
    # the common case for (B, S, D) activations -- take the no-pad/no-slice path).
    n_pad = (-n) % _LANE
    xf = x.reshape(B, n)
    if n_pad:
        xf = jnp.pad(xf, ((0, 0), (0, n_pad)))
    rows = (n + n_pad) // _LANE
    xr = xf.reshape(B, rows, _LANE)

    cost = pl.CostEstimate(flops=xr.size, transcendentals=0,
                           bytes_accessed=2 * xr.size * itemsize)

    if rows < _SMALL_ROWS:
        # ---- Batched-samples path: fold many samples into one big block. ----
        scale = (mask_f * jnp.float32(inv_keep)).reshape(B, 1, 1)   # f32
        bb = max(1, min(B, block_bytes // max(1, rows * bytes_per_row)))
        if B >= 2:
            bb = min(bb, pl.cdiv(B, 2))   # >= 2 grid steps for v7x megacore
        grid = (pl.cdiv(B, bb),)          # ragged last batch block is masked
        out = pl.pallas_call(
            _batched_kernel,
            out_shape=jax.ShapeDtypeStruct(xr.shape, x.dtype),
            grid=grid,
            in_specs=[
                pl.BlockSpec((bb, 1, 1), lambda i: (i, 0, 0)),
                pl.BlockSpec((bb, rows, _LANE), lambda i: (i, 0, 0)),
            ],
            out_specs=pl.BlockSpec((bb, rows, _LANE), lambda i: (i, 0, 0)),
            compiler_params=pltpu.CompilerParams(
                dimension_semantics=("parallel",),
                vmem_limit_bytes=_VMEM_LIMIT),
            cost_estimate=cost,
        )(scale, xr)
    else:
        # ---- Per-sample path: large samples, dropped-sample DMA skip. ----
        mask_i = mask_f.astype(jnp.int32)                           # (B,)
        tr_cap = max(sub, (block_bytes // bytes_per_row) // sub * sub)
        tr = max(sub, (min(rows, tr_cap) // sub) * sub)
        n_tiles = pl.cdiv(rows, tr)       # ragged last row block is masked
        if B == 1 and n_tiles == 1 and rows >= 2 * sub:
            # Split so v7x megacore has >= 2 grid steps to share.
            tr = max(sub, pl.cdiv(pl.cdiv(rows, 2), sub) * sub)
            n_tiles = pl.cdiv(rows, tr)

        def x_index_map(b, t, mask_ref):
            # Dropped sample -> stay on row-block 0: the pipeline reuses the
            # resident block instead of re-fetching from HBM.
            return (b, mask_ref[b] * t, 0)

        def o_index_map(b, t, mask_ref):
            return (b, t, 0)

        grid_spec = pltpu.PrefetchScalarGridSpec(
            num_scalar_prefetch=1,
            grid=(B, n_tiles),
            in_specs=[pl.BlockSpec((1, tr, _LANE), x_index_map)],
            out_specs=pl.BlockSpec((1, tr, _LANE), o_index_map),
        )
        out = pl.pallas_call(
            partial(_per_sample_kernel, inv_keep),
            out_shape=jax.ShapeDtypeStruct(xr.shape, x.dtype),
            grid_spec=grid_spec,
            compiler_params=pltpu.CompilerParams(
                dimension_semantics=("parallel", "parallel"),
                vmem_limit_bytes=_VMEM_LIMIT),
            cost_estimate=cost,
        )(mask_i, xr)

    if n_pad:
        out = out.reshape(B, rows * _LANE)[:, :n]
    return out.reshape(orig_shape)


class DropPath:
    """Mirror of the PyTorch DropPath module (no learnable parameters)."""

    def __init__(self, drop_prob=None):
        self.drop_prob = drop_prob
        self.training = True   # PyTorch modules default to training mode

    def __call__(self, x, *, key=None, seed: int = 0):
        p = 0.0 if self.drop_prob is None else float(self.drop_prob)
        return drop_path(x, p, self.training, key=key, seed=seed)


if __name__ == "__main__":
    keep_prob = 0.7
    drop_prob = 1.0 - keep_prob

    def reference(x, key):
        b = x.shape[0]
        u = jax.random.uniform(key, (b,), dtype=jnp.float32)
        m = jnp.floor(jnp.float32(keep_prob) + u) / jnp.float32(keep_prob)
        return (x.reshape(b, -1) * m[:, None]).reshape(x.shape).astype(x.dtype)

    root = jax.random.PRNGKey(0)
    kx1, kx2, kx3 = jax.random.split(root, 3)
    mod = DropPath(drop_prob=drop_prob)

    # 1) Small-per-sample input -> batched-samples path: (2, 4, 16, 16), rows=8.
    x1 = jax.random.normal(kx1, (2, 4, 16, 16), dtype=jnp.float32)
    y1 = jax.block_until_ready(mod(x1, key=jax.random.PRNGKey(42)))
    assert y1.shape == x1.shape and y1.dtype == x1.dtype
    assert jnp.allclose(y1, reference(x1, jax.random.PRNGKey(42)),
                        atol=1e-5, rtol=1e-5)

    # 2) Large-per-sample input -> per-sample path with scalar-prefetch DMA skip
    #    and a ragged last row block (block_bytes shrunk to force n_tiles > 1).
    x2 = jax.random.normal(kx2, (2, 520, 128), dtype=jnp.float32)
    y2 = jax.block_until_ready(
        drop_path(x2, drop_prob, True, key=jax.random.PRNGKey(7),
                  block_bytes=128 * 1024))
    assert jnp.allclose(y2, reference(x2, jax.random.PRNGKey(7)),
                        atol=1e-5, rtol=1e-5)

    # 3) Lane-misaligned trailing size -> pad/slice fallback path.
    x3 = jax.random.normal(kx3, (2, 5, 7), dtype=jnp.float32)
    y3 = jax.block_until_ready(mod(x3, key=jax.random.PRNGKey(3)))
    assert jnp.allclose(y3, reference(x3, jax.random.PRNGKey(3)),
                        atol=1e-5, rtol=1e-5)

    # 4) Eval mode / zero prob is an identity pass-through (same as PyTorch).
    mod.training = False
    y_eval = jax.block_until_ready(mod(x1))
    assert bool(jnp.all(y_eval == x1))
    mod.training = True

    # 5) drop_prob = 1.0 must produce exact zeros (no NaN/inf from div-by-0).
    y_all = jax.block_until_ready(
        DropPath(drop_prob=1.0)(x1, key=jax.random.PRNGKey(9)))
    assert bool(jnp.all(y_all == 0.0))

    print("KERNEL_OK")
</pallas_src>

<mosaic_0001>
module attributes {stable_mosaic.version = 11 : i64} {
  func.func @_batched_kernel(%arg0: i32, %arg1: memref<1x1x1xf32, #tpu.memory_space<vmem>>, %arg2: memref<1x8x128xf32, #tpu.memory_space<vmem>>, %arg3: memref<1x8x128xf32, #tpu.memory_space<vmem>>) attributes {dimension_semantics = [#tpu.dimension_semantics<parallel>], iteration_bounds = array<i64: 2>, scalar_prefetch = 0 : i64, scratch_operands = 0 : i64, tpu.core_type = #tpu.core_type<tc>, window_params = [{transform_indices = @transform_0, window_bounds = array<i64: 1, 1, 1>}, {transform_indices = @transform_1, window_bounds = array<i64: 1, 8, 128>}, {transform_indices = @transform_2, window_bounds = array<i64: 1, 8, 128>}]} {
    %c0 = arith.constant 0 : index
    %c0_0 = arith.constant 0 : index
    %c0_1 = arith.constant 0 : index
    %0 = vector.load %arg2[%c0, %c0_0, %c0_1] : memref<1x8x128xf32, #tpu.memory_space<vmem>>, vector<1x8x128xf32>
    %c0_2 = arith.constant 0 : index
    %c0_3 = arith.constant 0 : index
    %c0_4 = arith.constant 0 : index
    %1 = vector.load %arg1[%c0_2, %c0_3, %c0_4] : memref<1x1x1xf32, #tpu.memory_space<vmem>>, vector<1x1x1xf32>
    %2 = vector.broadcast %1 : vector<1x1x1xf32> to vector<1x8x128xf32>
    %3 = arith.mulf %0, %2 : vector<1x8x128xf32>
    %c0_5 = arith.constant 0 : index
    %c0_6 = arith.constant 0 : index
    %c0_7 = arith.constant 0 : index
    %4 = vector.load %arg3[%c0_5, %c0_6, %c0_7] : memref<1x8x128xf32, #tpu.memory_space<vmem>>, vector<1x8x128xf32>
    tpu.vector_store %arg3[%c0_5, %c0_6, %c0_7], %3 {strides = array<i32>} : memref<1x8x128xf32, #tpu.memory_space<vmem>>, vector<1x8x128xf32>,
    return
  }
  func.func @transform_0(%arg0: i32) -> (i32, i32, i32) {
    %c0_i32 = arith.constant 0 : i32
    %c0_i32_0 = arith.constant 0 : i32
    %c0_i32_1 = arith.constant 0 : i32
    return %arg0, %c0_i32, %c0_i32_0 : i32, i32, i32
  }
  func.func @transform_1(%arg0: i32) -> (i32, i32, i32) {
    %c0_i32 = arith.constant 0 : i32
    %c0_i32_0 = arith.constant 0 : i32
    %c0_i32_1 = arith.constant 0 : i32
    return %arg0, %c0_i32, %c0_i32_0 : i32, i32, i32
  }
  func.func @transform_2(%arg0: i32) -> (i32, i32, i32) {
    %c0_i32 = arith.constant 0 : i32
    %c0_i32_0 = arith.constant 0 : i32
    %c0_i32_1 = arith.constant 0 : i32
    return %arg0, %c0_i32, %c0_i32_0 : i32, i32, i32
  }
}

</mosaic_0001>

<bundles_post_ra>
// kernel: tpu_custom_call.1
= control target key start
LH: loop header
LB: loop body
LE: loop exit
PB: predicated region body
PF: predicated region fallthrough
CT: control target
= control target key end

     0   :  { %7 = vsyncpa [#allocation3], 0  ;;  %s598_s0 = inlined_call_operand.vmem [shape: f32[2,1,1], index: 0, kind: input, shape index: {}]   ;;  %s599_s1 = inlined_call_operand.hbm [shape: f32[2,8,128], index: 1, kind: input, shape index: {}]   ;;  %s600_s2 = inlined_call_operand.hbm [shape: f32[2,8,128], index: 2, kind: output, shape index: {}]  }
   0x1   :  { %9 = vsyncpa [#allocation3 + $0x1], 0 }
   0x2   :  { %10 = vsyncpa [#allocation4], 0 }
   0x3   :  { %12 = vsyncpa [#allocation4 + $0x1], 0  ;;  %s452_s9 = smov 0   ;;  %s454_s10 = smov 0  }
   0x4   :  { %s456_s11 = smov 0   ;;  %s458_s12 = smov 0  }
   0x5 LB: > { %s473_s13 = sadd.s32 4294967295, %s432_s12   ;;  %s279_s14 = sadd.s32 4294967294, %s432_s12   ;;  %s432_s12 = sphi %s458_s12, %s617_s12   ;;  %s428_s11 = sphi %s456_s11, %s616_s11   ;;  %s424_s10 = sphi %s454_s10, %s615_s10   ;;  %s420_s9 = sphi %s452_s9, %s614_s9  }
   0x6   : > { %s477_s15 = sadd.s32 1, %s432_s12   ;;  %s51_s16 = sadd.s32 1, %s428_s11 }
   0x7   : > { %s48_s17 = ssub.s32 %s432_s12, %s477_s15  ;;  %p58_p0 = scmp.ne.s32.totalorder %s428_s11, %s424_s10 }
   0x8   : > { %p49_p1 = scmp.eq.s32.totalorder %s48_s17, 0  ;;  %p59_p2 = scmp.eq.s32.totalorder %s432_s12, 0 }
   0x9   : > { %p64_p3 = scmp.ne.s32.totalorder %s424_s10, %s420_s9  ;;  %p65_p4 = scmp.eq.s32.totalorder %s473_s13, 0 }
   0xa   : > { %s489_s18 = scalar_select %p49_p1, %s428_s11, %s51_s16  }
   0xb   : > { %p491_p5 = por %p59_p2, %p58_p0  ;;  %p495_p6 = por %p65_p4, %p64_p3 }
   0xc   : > { %p88_p7 = scmp.eq.s32.totalorder %s473_s13, 1  ;;  %p94_p8 = scmp.eq.s32.totalorder %s279_s14, 1 }
   0xd   : > { %s604_s20 = scalar_select %p495_p6, 1, 0 }
   0xe   : > { %p304_p10 = scmp.lt.s32.totalorder %s432_s12, 2  ;;  %p502_p11 = por %p88_p7, %p58_p0 }
   0xf   : > { %p506_p12 = por %p94_p8, %p64_p3  ;;  %s120_s23 = sand.u32 1, %s428_s11  }
  0x10   : > { %s605_s21 = scalar_select %p502_p11, 1, 0 }
  0x11   : > { %s606_s22 = scalar_select %p506_p12, 1, 0 }
  0x12   : > { %s283_s24 = sshll.u32 %s432_s12, 7  ;;  %s282_s25 = sshll.u32 %s120_s23, 3 }
  0x13   : > { %s515_s28 = scalar_lea.hbm %s599_s1, %s283_s24  ;;  %s124_s29 = scalar_lea.vmem [#allocation2], %s282_s25 }
  0x14   : > { %s131_s30 = sshll.u32 %s124_s29, 4  ;;  %p519_p13 = pnand %p304_p10, %p491_p5  ;;  %s523_s30 = int_to_ptr.vmem [resolvable:$true] %s131_s30 }
  0x15   : > { %s121_s4 = scalar_lea.sflag [#allocation3], %s120_s23  ;;  %s340_s5 = scalar_lea.hbm %s515_s28, 128 }
  0x16   : > { %p341_p2 = scmp.ne.s32.totalorder %s515_s28, %s340_s5  ;;  %p342_p3 = pneg %p519_p13 }
  0x17   : > { %s345_s8 = scalar_lea.hbm %s599_s1, 256  ;;  %p346_p5 = scmp.lt.s32.totalorder %s515_s28, %s599_s1 }
  0x18   : > { %p343_p4 = pnand %p342_p3, %p341_p2  ;;  %p347_p8 = scmp.lt.s32.totalorder %s345_s8, %s340_s5 }
  0x1a   : > { %p344_p7 = pneg %p343_p4  ;;  %p348_p10 = por %p347_p8, %p346_p5 }
  0x1c   : > { %p349_p9 = pnand %p348_p10, %p344_p7 }
  0x1e   : > { %352 = shalt.err (!%p349_p9)
}
  0x1f   : > { %s353_s17 = scalar_lea.vmem %s523_s30, 128  ;;  %s434_s19 = smov [#allocation2]  }
  0x20   : > { %p354_p0 = scmp.ne.s32.totalorder %s523_s30, %s353_s17  ;;  %s358_s23 = sshll.u32 %s434_s19, 4  ;;  %s359_s23 = int_to_ptr.vmem [resolvable:$false] %s358_s23 }
  0x21   : > { %s360_s24 = scalar_lea.vmem %s359_s23, 256  ;;  %p361_p4 = scmp.lt.s32.totalorder %s523_s30, %s359_s23 }
  0x22   : > { %p356_p1 = pnand %p354_p0, %p342_p3  ;;  %p362_p12 = scmp.lt.s32.totalorder %s360_s24, %s353_s17 }
  0x24   : > { %p357_p2 = pneg %p356_p1  ;;  %p363_p11 = por %p362_p12, %p361_p4 }
  0x26   : > { %p364_p6 = pnand %p363_p11, %p357_p2 }
  0x28   : > { %367 = shalt.err (!%p364_p6)
}
  0x29   : > { %299 = dma.hbm_to_vmem [thread:$0]  (!%p519_p13), %s515_s28, 128, %s523_s30, %s121_s4  }
  0x2a   : > { %p608_p9 = scmp.lt.s32.totalorder %s432_s12, 3  ;;  %p609_p7 = scmp.ge.s32.totalorder %s432_s12, 1 }
  0x2c   : > { %p137_p0 = pnand %p609_p7, %p608_p9 }
  0x2d   : > { %s550_s25 = sand.u32 (!%p137_p0), 1, %s424_s10   ;;  %p610_p6 = scmp.ne.s32.totalorder (!%p137_p0), %s604_s20, 0 }
  0x2e   : > { %140 = sbr.rel (%p137_p0) target bundleno = 197 (0xc5), region = 28  ;;  %s285_s26 = sshll.u32 (!%p137_p0), %s550_s25, 3 }
  0x2f   : > { %s143_s27 = scalar_lea.sflag (!%p137_p0), [#allocation3], %s550_s25  ;;  %s146_s29 = scalar_lea.vmem (!%p137_p0), [#allocation2], %s285_s26 }
  0x33   : > { %411 = dma.done.wait (%p610_p6), %s143_s27, 128  }
  0x34   : > { %413 = vsyncadd (%p610_p6), %s143_s27, 4294967168  ;;  %p170_p11 = scmp.lt.s32.totalorder %s473_s13, 1  ;;  %v435_v0 = vmov 0   ;;  %v173_v2 = vld [vmem:[%s146_s29] sm:$0xff]  ;;  %s289_s5 = sshll.u32 %s473_s13, 7 }
  0x35   : > { %339 = vset.pattern.permute.xlu0 %v435_v0  ;;  %s169_s6 = scalar_lea.vmem [#allocation5], %s285_s26  ;;  %s198_s14 = scalar_lea.hbm %s600_s2, %s289_s5 }
  0x36   : > { %s171_s28 = scalar_select %p170_p11, %s473_s13, 1 }
  0x37   : > { %s200_s20 = sshll.u32 %s169_s6, 4  ;;  %s187_s16 = scalar_lea.sflag [#allocation4], %s550_s25  ;;  %s201_s20 = int_to_ptr.vmem [resolvable:$true] %s200_s20 }
  0x38   : > { %s172_s4 = scalar_lea.vmem %s598_s0, %s171_s28  ;;  %s368_s17 = scalar_lea.vmem %s201_s20, 128 }
  0x39   : > { %v287_v1 = vld [vmem:[%s172_s4] ss:$0 sm:$0xff]  ;;  %p369_p12 = scmp.ne.s32.totalorder %s201_s20, %s368_s17  ;;  %p611_p13 = scmp.ne.s32.totalorder %s605_s21, 0 }
  0x3a   : > { %181 = vperm.xlu0 %339, %v287_v1   ;;  %s436_s19 = smov [#allocation5]  }
  0x3b   : > { %p370_p1 = pnand %p369_p12, %p611_p13  ;;  %s372_s23 = sshll.u32 %s436_s19, 4  ;;  %s373_s23 = int_to_ptr.vmem [resolvable:$false] %s372_s23 }
  0x3c   : > { %s374_s13 = scalar_lea.vmem %s373_s23, 256  ;;  %p375_p5 = scmp.lt.s32.totalorder %s201_s20, %s373_s23 }
  0x3d   : > { %p371_p3 = pneg %p370_p1  ;;  %p376_p8 = scmp.lt.s32.totalorder %s374_s13, %s368_s17 }
  0x3f   : > { %p377_p10 = por %p376_p8, %p375_p5 }
  0x41   : > { %p378_p2 = pnand %p377_p10, %p371_p3 }
  0xb5   : > { %v182_v3 = vpop.permute.xlu0 %181 }
  0xb6   : > { %v184_v4 = vmul.f32 %v182_v3, %v173_v2 }
  0xb8   : > { %185 = vst [vmem:[%s169_s6] sm:$0xff] %v184_v4 }
  0xb9   : > { %381 = shalt.err (!%p378_p2)
}
  0xba   : > { %s382_s24 = scalar_lea.hbm %s198_s14, 128  ;;  %s386_s27 = scalar_lea.hbm %s600_s2, 256 }
  0xbb   : > { %p383_p4 = scmp.ne.s32.totalorder %s198_s14, %s382_s24  ;;  %p387_p0 = scmp.lt.s32.totalorder %s198_s14, %s600_s2 }
  0xbc   : > { %p388_p6 = scmp.lt.s32.totalorder %s386_s27, %s382_s24 }
  0xbd   : > { %p384_p9 = pnand %p383_p4, %p611_p13 }
  0xbe   : > { %p389_p11 = por %p388_p6, %p387_p0 }
  0xbf   : > { %p385_p7 = pneg %p384_p9 }
  0xc1   : > { %p390_p12 = pnand %p389_p11, %p385_p7 }
  0xc3   : > { %393 = shalt.err (!%p390_p12)
}
  0xc4   : > { %294 = dma.vmem_to_hbm [thread:$0]  (%p611_p13), %s201_s20, 128, %s198_s14, %s187_s16  }
  0xc5 PF: > { %s212_s30 = sand.u32 1, %s420_s9   ;;  %p612_p1 = scmp.ne.s32.totalorder %s606_s22, 0 }
  0xc6   : > { %p613_p3 = scmp.ge.s32.totalorder %s432_s12, 2  ;;  %s213_s3 = scalar_lea.sflag [#allocation4], %s212_s30 }
  0xc8   : > { %p301_p5 = pnand %p613_p3, %p612_p1 }
  0xca   : > { %p302_p8 = pneg %p301_p5 }
  0xcc   : > { %415 = dma.done.wait (%p302_p8), %s213_s3, 128  }
  0xcd   : > { %417 = vsyncadd (%p302_p8), %s213_s3, 4294967168  ;;  %p15_p10 = scmp.ge.s32.totalorder %s477_s15, 4   ;;  %s614_s9 = smov %s424_s10 }
  0xce   : > { %s615_s10 = smov %s428_s11  ;;  %s616_s11 = smov %s489_s18 }
  0xcf   : > { %s617_s12 = smov %s477_s15  ;;  %17 = sbr.rel (!%p15_p10) target bundleno = 5 (0x5), region = 76 }
  0xd4   :  { %218 = vsyncpa [#allocation3], 1 }
  0xd5   :  { %220 = vsyncpa [#allocation3 + $0x1], 1 }
  0xd6   :  { %221 = vsyncpa [#allocation4], 1 }
  0xd7   :  { %223 = vsyncpa [#allocation4 + $0x1], 1 }

</bundles_post_ra>
